<compile_context>
chip_gen: v7x
topology: tpu7x:2x2x1
jax: 0.10.0
libtpu: 0.0.40
codegen_flags: <defaults>
</compile_context>

<pallas_src>
import functools
import math

import jax
import jax.numpy as jnp
from jax.experimental import pallas as pl
from jax.experimental.pallas import tpu as pltpu


# ---------------------------------------------------------------------------
# helpers
# ---------------------------------------------------------------------------
def _ceil_to(x, q):
    return -(-x // q) * q


def _vmem_tile_bytes(rows, cols, dtype):
    """VMEM bytes of one (rows, cols) block after (sublane, lane) padding."""
    itemsize = jnp.dtype(dtype).itemsize
    sub = 8 * (4 // itemsize)          # 8 sublanes for f32, 16 for bf16 (packed)
    return _ceil_to(rows, sub) * _ceil_to(cols, 128) * itemsize


# ---------------------------------------------------------------------------
# Fused MLP kernel.
#   refs = [x, w0, b0, w1, b1, ..., w_{L-1}, b_{L-1}, out, (acc if n_k_steps>1)]
#   Layer 0 is (optionally) accumulated over the K grid axis; layers 1..L-1
#   run in the epilogue on the VMEM-resident activation.
# ---------------------------------------------------------------------------
def _fused_mlp_kernel(*refs, n_layers, n_k_steps):
    x_ref = refs[0]
    w_refs = [refs[1 + 2 * i] for i in range(n_layers)]
    b_refs = [refs[2 + 2 * i] for i in range(n_layers)]
    o_ref = refs[1 + 2 * n_layers]

    def epilogue(h0_f32):
        h = h0_f32 + b_refs[0][...]              # (tm, N0) + (1, N0) broadcast, f32
        if n_layers > 1:
            h = jnp.maximum(h, 0.0)
        for i in range(1, n_layers):
            h = jnp.dot(h, w_refs[i][...], preferred_element_type=jnp.float32)
            h = h + b_refs[i][...]
            if i < n_layers - 1:                  # no ReLU after the last layer
                h = jnp.maximum(h, 0.0)
        o_ref[...] = h.astype(o_ref.dtype)

    if n_k_steps == 1:
        # Single contraction step: no accumulator scratch, write directly.
        epilogue(
            jnp.dot(x_ref[...], w_refs[0][...], preferred_element_type=jnp.float32)
        )
    else:
        acc_ref = refs[2 + 2 * n_layers]
        k = pl.program_id(1)

        @pl.when(k == 0)
        def _():
            acc_ref[...] = jnp.zeros_like(acc_ref)

        acc_ref[...] += jnp.dot(
            x_ref[...], w_refs[0][...], preferred_element_type=jnp.float32
        )

        @pl.when(k == n_k_steps - 1)
        def _():
            epilogue(acc_ref[...])


# ---------------------------------------------------------------------------
# Wrapper: builds specs / grid and launches the single fused pallas_call.
# ---------------------------------------------------------------------------
def fused_mlp_pallas(x2d, params, *, compute_dtype=jnp.bfloat16,
                     x_vmem_budget_bytes=8 << 20, tm_cap=2048):
    """Fused  y = relu(...relu(x2d @ W0 + b0)... ) @ W_{L-1} + b_{L-1}.

    x2d:    (M, K0) float32
    params: list of (w_t, b) with w_t shape (in, out)  -- already transposed.
    """
    M, K0 = x2d.shape
    n_layers = len(params)
    dims = [K0] + [w.shape[1] for (w, _) in params]
    for i, (w, b) in enumerate(params):
        assert w.shape == (dims[i], dims[i + 1])
        assert b.shape == (dims[i + 1],)
    n_out = dims[-1]
    out_dtype = x2d.dtype
    itemsize = jnp.dtype(compute_dtype).itemsize

    # ---- K tiling: avoid unless K0 is truly enormous -----------------------
    # A single K step keeps W0's block index constant over the whole grid (it
    # is DMA'd from HBM once) and removes the accumulator scratch entirely.
    if 2 * 8 * K0 * itemsize <= x_vmem_budget_bytes:
        tk = K0                                   # the common case (K0=1024 here)
    else:
        # Enormous flattened K: pick tk as a divisor of K0 that is a multiple
        # of 128 -- never pad the activation along K in HBM.
        tk_max = x_vmem_budget_bytes // (2 * 8 * itemsize)
        tk = 0
        cand = (min(tk_max, K0) // 128) * 128
        while cand >= 128:
            if K0 % cand == 0:
                tk = cand
                break
            cand -= 128
        if tk == 0:
            # TODO(synk): handle a ragged K tail in-kernel (masked short slice)
            # instead of falling back to one oversized K block.
            tk = K0
    n_k = K0 // tk

    # ---- row tiling from a per-call VMEM budget -----------------------------
    rows_budget = x_vmem_budget_bytes // (2 * tk * itemsize)
    rows_budget = int(min(max(rows_budget, 8), tm_cap))

    if M <= rows_budget:
        if M >= 512:
            # Split into two row tiles so the "parallel" m axis can shard
            # across v7x's two TensorCores (pads at most 7 rows).
            tm = _ceil_to(-(-M // 2), 8)
            M_pad = 2 * tm
        else:
            tm = M                                # full-M block for tiny batches
            M_pad = M
    else:
        quantum = 256 if M >= 256 else 8
        M_pad = _ceil_to(M, quantum)
        tm = quantum
        cand = (rows_budget // quantum) * quantum
        while cand >= quantum:
            if M_pad % cand == 0:
                tm = cand
                break
            cand -= quantum
    n_m = M_pad // tm

    # ---- prepare operands (pad rows if needed, cast layer-0 to bf16) --------
    x_proc = x2d
    if M_pad != M:
        x_proc = jnp.pad(x_proc, ((0, M_pad - M), (0, 0)))
    x_c = x_proc.astype(compute_dtype)
    w0_c = params[0][0].astype(compute_dtype)

    # ---- specs / args --------------------------------------------------------
    in_specs = [pl.BlockSpec((tm, tk), lambda m, k: (m, k))]
    args = [x_c]
    # layer 0: weight (tiled over K only if n_k > 1), bias broadcast
    in_specs.append(pl.BlockSpec((tk, dims[1]), lambda m, k: (k, 0)))
    args.append(w0_c)
    in_specs.append(pl.BlockSpec((1, dims[1]), lambda m, k: (0, 0)))
    args.append(params[0][1].reshape(1, dims[1]))
    # layers 1..L-1: whole (tiny) weight/bias resident in VMEM, constant block
    for i in range(1, n_layers):
        w, b = params[i]
        in_specs.append(pl.BlockSpec((dims[i], dims[i + 1]), lambda m, k: (0, 0)))
        args.append(w)
        in_specs.append(pl.BlockSpec((1, dims[i + 1]), lambda m, k: (0, 0)))
        args.append(b.reshape(1, dims[i + 1]))

    scratch_shapes = []
    if n_k > 1:
        scratch_shapes.append(pltpu.VMEM((tm, dims[1]), jnp.float32))

    # ---- VMEM limit (double-buffered, layout-padded blocks + margin) --------
    vmem_est = 2 * _vmem_tile_bytes(tm, tk, compute_dtype)           # x
    vmem_est += 2 * _vmem_tile_bytes(tk, dims[1], compute_dtype)     # W0
    vmem_est += 2 * _vmem_tile_bytes(tm, n_out, out_dtype)           # out
    vmem_est += 2 * _vmem_tile_bytes(1, dims[1], jnp.float32)        # b0
    for i in range(1, n_layers):
        vmem_est += 2 * _vmem_tile_bytes(dims[i], dims[i + 1], jnp.float32)
        vmem_est += 2 * _vmem_tile_bytes(1, dims[i + 1], jnp.float32)
    if n_k > 1:
        vmem_est += _vmem_tile_bytes(tm, dims[1], jnp.float32)       # acc scratch
    vmem_est += 2 * _vmem_tile_bytes(tm, dims[1], jnp.float32)       # epilogue temps
    vmem_limit = min(max(int(vmem_est * 1.5) + (4 << 20), 16 << 20), 48 << 20)

    # ---- advisory cost estimate ---------------------------------------------
    flops = 0
    for i in range(n_layers):
        flops += 2 * M_pad * dims[i] * dims[i + 1]
    bytes_accessed = (M_pad * K0 * itemsize
                      + M_pad * n_out * jnp.dtype(out_dtype).itemsize
                      + K0 * dims[1] * itemsize)
    for i in range(1, n_layers):
        bytes_accessed += dims[i] * dims[i + 1] * 4
    for i in range(n_layers):
        bytes_accessed += dims[i + 1] * 4

    kernel = functools.partial(
        _fused_mlp_kernel, n_layers=n_layers, n_k_steps=n_k
    )

    out = pl.pallas_call(
        kernel,
        out_shape=jax.ShapeDtypeStruct((M_pad, n_out), out_dtype),
        grid_spec=pltpu.PrefetchScalarGridSpec(
            num_scalar_prefetch=0,
            grid=(n_m, n_k),
            in_specs=in_specs,
            out_specs=pl.BlockSpec((tm, n_out), lambda m, k: (m, 0)),
            scratch_shapes=scratch_shapes,
        ),
        compiler_params=pltpu.CompilerParams(
            dimension_semantics=("parallel", "arbitrary"),
            vmem_limit_bytes=vmem_limit,
        ),
        cost_estimate=pl.CostEstimate(
            flops=flops, transcendentals=0, bytes_accessed=bytes_accessed
        ),
    )(*args)

    if M_pad != M:
        out = out[:M]
    return out


# ---------------------------------------------------------------------------
# FullyConnectedNet forward (glue in plain JAX, hot path in one Pallas call).
# ---------------------------------------------------------------------------
def init_params(widths, key):
    """PyTorch-Linear-style init, weights stored pre-transposed as (in, out)."""
    params = []
    for i in range(len(widths) - 1):
        fan_in, fan_out = widths[i], widths[i + 1]
        key, kw, kb = jax.random.split(key, 3)
        bound = 1.0 / math.sqrt(fan_in)
        w_t = jax.random.uniform(kw, (fan_in, fan_out), jnp.float32, -bound, bound)
        b = jax.random.uniform(kb, (fan_out,), jnp.float32, -bound, bound)
        params.append((w_t, b))
    return params


def fully_connected_net_forward(x, params, output_shape=None,
                                compute_dtype=jnp.bfloat16):
    h = x.reshape(x.shape[0], -1)                 # input.view(B, -1)
    out = fused_mlp_pallas(h, params, compute_dtype=compute_dtype)
    if output_shape is not None:
        out = out.reshape(output_shape)
    return out


def fully_connected_net_reference(x, params, output_shape=None, compute_dtype=None):
    """Pure-JAX reference. If compute_dtype is set, the first matmul's inputs
    are cast to it (matching the kernel's bf16 call-boundary cast)."""
    h = x.reshape(x.shape[0], -1)
    n_layers = len(params)
    for i, (w_t, b) in enumerate(params):
        if i == 0 and compute_dtype is not None:
            h = jnp.dot(h.astype(compute_dtype), w_t.astype(compute_dtype),
                        preferred_element_type=jnp.float32) + b
        else:
            h = jnp.dot(h, w_t, preferred_element_type=jnp.float32) + b
        if i < n_layers - 1:
            h = jnp.maximum(h, 0.0)
    if output_shape is not None:
        h = h.reshape(output_shape)
    return h


if __name__ == "__main__":
    key = jax.random.PRNGKey(0)
    key, kx = jax.random.split(key)

    # Small shapes consistent with the module: NCHW image input, flattened to 1024.
    B, C, H, W = 2, 4, 16, 16
    widths = [C * H * W, 32, 32, 10]              # weights = [1024, 32, 32, 10]
    output_shape = None                            # module default

    x = jax.random.normal(kx, (B, C, H, W), dtype=jnp.float32)
    params = init_params(widths, key)

    out = fully_connected_net_forward(x, params, output_shape)
    out = jax.block_until_ready(out)

    ref_matched = fully_connected_net_reference(x, params, output_shape,
                                                compute_dtype=jnp.bfloat16)
    ref_f32 = fully_connected_net_reference(x, params, output_shape)

    assert out.shape == (B, widths[-1])
    assert jnp.allclose(out, ref_matched, atol=2e-3, rtol=2e-3), \
        "mismatch vs bf16-matched reference"
    assert jnp.allclose(out, ref_f32, atol=3e-2, rtol=3e-2), \
        "mismatch vs f32 reference"

    print("KERNEL_OK")
</pallas_src>

<mosaic_0001>
module attributes {stable_mosaic.version = 11 : i64} {
  func.func @_fused_mlp_kernel(%arg0: i32, %arg1: i32, %arg2: memref<2x1024xbf16, #tpu.memory_space<vmem>>, %arg3: memref<1024x32xbf16, #tpu.memory_space<vmem>>, %arg4: memref<1x32xf32, #tpu.memory_space<vmem>>, %arg5: memref<32x32xf32, #tpu.memory_space<vmem>>, %arg6: memref<1x32xf32, #tpu.memory_space<vmem>>, %arg7: memref<32x10xf32, #tpu.memory_space<vmem>>, %arg8: memref<1x10xf32, #tpu.memory_space<vmem>>, %arg9: memref<2x10xf32, #tpu.memory_space<vmem>>) attributes {dimension_semantics = [#tpu.dimension_semantics<parallel>, #tpu.dimension_semantics<arbitrary>], iteration_bounds = array<i64: 1, 1>, scalar_prefetch = 0 : i64, scratch_operands = 0 : i64, tpu.core_type = #tpu.core_type<tc>, window_params = [{transform_indices = @transform_0, window_bounds = array<i64: 2, 1024>}, {transform_indices = @transform_1, window_bounds = array<i64: 1024, 32>}, {pipeline_mode = #tpu.pipeline_mode<synchronous>, transform_indices = @transform_2, window_bounds = array<i64: 1, 32>}, {pipeline_mode = #tpu.pipeline_mode<synchronous>, transform_indices = @transform_3, window_bounds = array<i64: 32, 32>}, {pipeline_mode = #tpu.pipeline_mode<synchronous>, transform_indices = @transform_4, window_bounds = array<i64: 1, 32>}, {pipeline_mode = #tpu.pipeline_mode<synchronous>, transform_indices = @transform_5, window_bounds = array<i64: 32, 10>}, {pipeline_mode = #tpu.pipeline_mode<synchronous>, transform_indices = @transform_6, window_bounds = array<i64: 1, 10>}, {transform_indices = @transform_7, window_bounds = array<i64: 2, 10>}]} {
    %c0 = arith.constant 0 : index
    %c0_0 = arith.constant 0 : index
    %0 = vector.load %arg2[%c0, %c0_0] : memref<2x1024xbf16, #tpu.memory_space<vmem>>, vector<2x1024xbf16>
    %c0_1 = arith.constant 0 : index
    %c0_2 = arith.constant 0 : index
    %1 = vector.load %arg3[%c0_1, %c0_2] : memref<1024x32xbf16, #tpu.memory_space<vmem>>, vector<1024x32xbf16>
    %cst = arith.constant dense<0.000000e+00> : vector<2x32xf32>
    %2 = tpu.matmul %0, %1, %cst {dimension_numbers = #tpu.dot_dimension_numbers<[1], [0], [0], [1], [0, 0, 1, 1], [], []>} : vector<2x1024xbf16>, vector<1024x32xbf16>, vector<2x32xf32> -> vector<2x32xf32>
    %c0_3 = arith.constant 0 : index
    %c0_4 = arith.constant 0 : index
    %3 = vector.load %arg4[%c0_3, %c0_4] : memref<1x32xf32, #tpu.memory_space<vmem>>, vector<1x32xf32>
    %4 = vector.broadcast %3 : vector<1x32xf32> to vector<2x32xf32>
    %5 = arith.addf %2, %4 : vector<2x32xf32>
    %cst_5 = arith.constant 0.000000e+00 : f32
    %6 = vector.broadcast %cst_5 : f32 to vector<2x32xf32>
    %7 = arith.maximumf %5, %6 : vector<2x32xf32>
    %c0_6 = arith.constant 0 : index
    %c0_7 = arith.constant 0 : index
    %8 = vector.load %arg5[%c0_6, %c0_7] : memref<32x32xf32, #tpu.memory_space<vmem>>, vector<32x32xf32>
    %cst_8 = arith.constant dense<0.000000e+00> : vector<2x32xf32>
    %9 = tpu.matmul %7, %8, %cst_8 {dimension_numbers = #tpu.dot_dimension_numbers<[1], [0], [0], [1], [0, 0, 1, 1], [], []>} : vector<2x32xf32>, vector<32x32xf32>, vector<2x32xf32> -> vector<2x32xf32>
    %c0_9 = arith.constant 0 : index
    %c0_10 = arith.constant 0 : index
    %10 = vector.load %arg6[%c0_9, %c0_10] : memref<1x32xf32, #tpu.memory_space<vmem>>, vector<1x32xf32>
    %11 = vector.broadcast %10 : vector<1x32xf32> to vector<2x32xf32>
    %12 = arith.addf %9, %11 : vector<2x32xf32>
    %cst_11 = arith.constant 0.000000e+00 : f32
    %13 = vector.broadcast %cst_11 : f32 to vector<2x32xf32>
    %14 = arith.maximumf %12, %13 : vector<2x32xf32>
    %c0_12 = arith.constant 0 : index
    %c0_13 = arith.constant 0 : index
    %15 = vector.load %arg7[%c0_12, %c0_13] : memref<32x10xf32, #tpu.memory_space<vmem>>, vector<32x10xf32>
    %cst_14 = arith.constant dense<0.000000e+00> : vector<2x10xf32>
    %16 = tpu.matmul %14, %15, %cst_14 {dimension_numbers = #tpu.dot_dimension_numbers<[1], [0], [0], [1], [0, 0, 1, 1], [], []>} : vector<2x32xf32>, vector<32x10xf32>, vector<2x10xf32> -> vector<2x10xf32>
    %c0_15 = arith.constant 0 : index
    %c0_16 = arith.constant 0 : index
    %17 = vector.load %arg8[%c0_15, %c0_16] : memref<1x10xf32, #tpu.memory_space<vmem>>, vector<1x10xf32>
    %18 = vector.broadcast %17 : vector<1x10xf32> to vector<2x10xf32>
    %19 = arith.addf %16, %18 : vector<2x10xf32>
    %c0_17 = arith.constant 0 : index
    %c0_18 = arith.constant 0 : index
    %20 = vector.load %arg9[%c0_17, %c0_18] : memref<2x10xf32, #tpu.memory_space<vmem>>, vector<2x10xf32>
    tpu.vector_store %arg9[%c0_17, %c0_18], %19 {strides = array<i32>} : memref<2x10xf32, #tpu.memory_space<vmem>>, vector<2x10xf32>,
    return
  }
  func.func @transform_0(%arg0: i32, %arg1: i32) -> (i32, i32) {
    %c0_i32 = arith.constant 0 : i32
    return %arg0, %arg1 : i32, i32
  }
  func.func @transform_1(%arg0: i32, %arg1: i32) -> (i32, i32) {
    %c0_i32 = arith.constant 0 : i32
    %c0_i32_0 = arith.constant 0 : i32
    return %arg1, %c0_i32 : i32, i32
  }
  func.func @transform_2(%arg0: i32, %arg1: i32) -> (i32, i32) {
    %c0_i32 = arith.constant 0 : i32
    %c0_i32_0 = arith.constant 0 : i32
    %c0_i32_1 = arith.constant 0 : i32
    return %c0_i32, %c0_i32_0 : i32, i32
  }
  func.func @transform_3(%arg0: i32, %arg1: i32) -> (i32, i32) {
    %c0_i32 = arith.constant 0 : i32
    %c0_i32_0 = arith.constant 0 : i32
    %c0_i32_1 = arith.constant 0 : i32
    return %c0_i32, %c0_i32_0 : i32, i32
  }
  func.func @transform_4(%arg0: i32, %arg1: i32) -> (i32, i32) {
    %c0_i32 = arith.constant 0 : i32
    %c0_i32_0 = arith.constant 0 : i32
    %c0_i32_1 = arith.constant 0 : i32
    return %c0_i32, %c0_i32_0 : i32, i32
  }
  func.func @transform_5(%arg0: i32, %arg1: i32) -> (i32, i32) {
    %c0_i32 = arith.constant 0 : i32
    %c0_i32_0 = arith.constant 0 : i32
    %c0_i32_1 = arith.constant 0 : i32
    return %c0_i32, %c0_i32_0 : i32, i32
  }
  func.func @transform_6(%arg0: i32, %arg1: i32) -> (i32, i32) {
    %c0_i32 = arith.constant 0 : i32
    %c0_i32_0 = arith.constant 0 : i32
    %c0_i32_1 = arith.constant 0 : i32
    return %c0_i32, %c0_i32_0 : i32, i32
  }
  func.func @transform_7(%arg0: i32, %arg1: i32) -> (i32, i32) {
    %c0_i32 = arith.constant 0 : i32
    %c0_i32_0 = arith.constant 0 : i32
    return %arg0, %c0_i32 : i32, i32
  }
}

</mosaic_0001>

<bundles_post_ra>
// kernel: tpu_custom_call.1
= control target key start
LH: loop header
LB: loop body
LE: loop exit
PB: predicated region body
PF: predicated region fallthrough
CT: control target
= control target key end

     0   :  { %v169_v28 = vlaneseq  ;;  %v1248_v36 = vmov 1966171168   ;;  %s1546_s0 = inlined_call_operand.vmem [shape: bf16[2,1024], index: 0, kind: input, shape index: {}]   ;;  %s1547_s1 = inlined_call_operand.vmem [shape: bf16[1024,32], index: 1, kind: input, shape index: {}]   ;;  %s1548_s2 = inlined_call_operand.vmem [shape: f32[1,32], index: 2, kind: input, shape index: {}]   ;;  %s1549_s3 = inlined_call_operand.vmem [shape: f32[32,32], index: 3, kind: input, shape index: {}]   ;;  %s1550_s4 = inlined_call_operand.vmem [shape: f32[1,32], index: 4, kind: input, shape index: {}]   ;;  %s1551_s5 = inlined_call_operand.vmem [shape: f32[32,10], index: 5, kind: input, shape index: {}]   ;;  %s1552_s6 = inlined_call_operand.vmem [shape: f32[1,10], index: 6, kind: input, shape index: {}]   ;;  %s1553_s7 = inlined_call_operand.hbm [shape: f32[2,10], index: 7, kind: output, shape index: {}]  }
   0x1   :  { %v1159_v0 = vld [vmem:[%s1547_s1 + $0x40] sm:$0xff]   ;;  %v1163_v4 = vld [vmem:[%s1547_s1 + $0x48] sm:$0xff]   ;;  %v1167_v8 = vld [vmem:[%s1547_s1 + $0x50] sm:$0xff]   ;;  %v167_v37 = vunpack.c.l.s4 %v1248_v36 }
   0x2   :  { %v1160_v1 = vld [vmem:[%s1547_s1 + $0xc0] sm:$0xff]   ;;  %1022 = vmatprep.subr.bf16.mxu0 %v1159_v0  ;;  %v1164_v5 = vld [vmem:[%s1547_s1 + $0xc8] sm:$0xff]   ;;  %v1168_v9 = vld [vmem:[%s1547_s1 + $0xd0] sm:$0xff]   ;;  %v170_v33 = vshrl.u32 %v169_v28, 7 }
   0x3   :  { %v1161_v2 = vld [vmem:[%s1547_s1] sm:$0xff]   ;;  %1044 = vmatprep.subr.bf16.mxu1 %v1160_v1  ;;  %v1165_v6 = vld [vmem:[%s1547_s1 + $0x8] sm:$0xff]   ;;  %v1169_v10 = vld [vmem:[%s1547_s1 + $0x10] sm:$0xff]   ;;  %v168_v40 = vunpack.c.0.s8 %v167_v37 }
   0x4   :  { %v1162_v3 = vld [vmem:[%s1547_s1 + $0x80] sm:$0xff]   ;;  %1023 = vmatpush3.bf16.msra.mxu0 %v1161_v2  ;;  %v1166_v7 = vld [vmem:[%s1547_s1 + $0x88] sm:$0xff]   ;;  %v1170_v11 = vld [vmem:[%s1547_s1 + $0x90] sm:$0xff]  }
   0x5   :  { %1045 = vmatpush3.bf16.msra.mxu1 %v1162_v3  ;;  %1024 = vmatprep.subr.bf16.mxu0 %v1163_v4  ;;  %v1171_v12 = vld [vmem:[%s1547_s1 + $0x58] sm:$0xff]   ;;  %v1175_v16 = vld [vmem:[%s1547_s1 + $0x60] sm:$0xff]   ;;  %v1179_v20 = vld [vmem:[%s1547_s1 + $0x68] sm:$0xff]   ;;  %v1398_v41 = vsub.s32 %v168_v40, %v170_v33 }
   0x6   :  { %1046 = vmatprep.subr.bf16.mxu1 %v1164_v5  ;;  %v1172_v13 = vld [vmem:[%s1547_s1 + $0xd8] sm:$0xff]   ;;  %v1176_v17 = vld [vmem:[%s1547_s1 + $0xe0] sm:$0xff]   ;;  %v1180_v21 = vld [vmem:[%s1547_s1 + $0xe8] sm:$0xff]  }
   0x7   :  { %v1173_v14 = vld [vmem:[%s1547_s1 + $0x18] sm:$0xff]   ;;  %v1177_v18 = vld [vmem:[%s1547_s1 + $0x20] sm:$0xff]   ;;  %v1181_v22 = vld [vmem:[%s1547_s1 + $0x28] sm:$0xff]  }
   0x8   :  { %1025 = vmatpush3.bf16.msra.mxu0 %v1165_v6  ;;  %v1174_v15 = vld [vmem:[%s1547_s1 + $0x98] sm:$0xff]   ;;  %v1178_v19 = vld [vmem:[%s1547_s1 + $0xa0] sm:$0xff]   ;;  %v1182_v23 = vld [vmem:[%s1547_s1 + $0xa8] sm:$0xff]  }
   0x9   :  { %1047 = vmatpush3.bf16.msra.mxu1 %v1166_v7  ;;  %1026 = vmatprep.subr.bf16.mxu0 %v1167_v8  ;;  %v1183_v24 = vld [vmem:[%s1547_s1 + $0x70] sm:$0xff]   ;;  %v1187_v29 = vld [vmem:[%s1547_s1 + $0x78] sm:$0xff]   ;;  %v28_v34 = vld [vmem:[%s1546_s0] sm:$0xff] }
   0xa   :  { %1048 = vmatprep.subr.bf16.mxu1 %v1168_v9  ;;  %v1184_v25 = vld [vmem:[%s1547_s1 + $0xf0] sm:$0xff]   ;;  %v1188_v30 = vld [vmem:[%s1547_s1 + $0xf8] sm:$0xff]   ;;  %v1192_v35 = vld [vmem:[%s1547_s1 + $0x140] sm:$0xff]   ;;  %v165_v39 = vcombine.high %v28_v34, %v28_v34  ;;  %v172_v42 = vrot.slane %v28_v34, %v1398_v41 }
   0xb   :  { %v1185_v26 = vld [vmem:[%s1547_s1 + $0x30] sm:$0xff]   ;;  %v1189_v31 = vld [vmem:[%s1547_s1 + $0x38] sm:$0xff]   ;;  %v1193_v38 = vld [vmem:[%s1547_s1 + $0x1c0] sm:$0xff]  }
   0xc   :  { %1027 = vmatpush3.bf16.msra.mxu0 %v1169_v10  ;;  %v1186_v27 = vld [vmem:[%s1547_s1 + $0xb0] sm:$0xff]   ;;  %v1190_v32 = vld [vmem:[%s1547_s1 + $0xb8] sm:$0xff]   ;;  %v1402_v43 = vrot.slane %v165_v39, %v1398_v41  ;;  %v180_v44 = vcombine.high %v172_v42, %v172_v42  ;;  %v188_v45 = vrot.slane %v172_v42, %v1398_v41  ;;  %v1194_v48 = vld [vmem:[%s1547_s1 + $0x100] sm:$0xff]  }
   0xd   :  { %1049 = vmatpush3.bf16.msra.mxu1 %v1170_v11  ;;  %1028 = vmatprep.subr.bf16.mxu0 %v1171_v12  ;;  %v1196_v51 = vld [vmem:[%s1547_s1 + $0x148] sm:$0xff]   ;;  %v1195_v53 = vld [vmem:[%s1547_s1 + $0x180] sm:$0xff]   ;;  %v1200_v57 = vld [vmem:[%s1547_s1 + $0x150] sm:$0xff]  }
   0xe   :  { %1050 = vmatprep.subr.bf16.mxu1 %v1172_v13  ;;  %v181_v46 = vcombine.high %v1402_v43, %v1402_v43  ;;  %v202_v47 = vrot.slane %v180_v44, %v1398_v41  ;;  %v210_v50 = vcombine.high %v188_v45, %v188_v45  ;;  %v1197_v54 = vld [vmem:[%s1547_s1 + $0x1c8] sm:$0xff]   ;;  %v1201_v59 = vld [vmem:[%s1547_s1 + $0x1d0] sm:$0xff]   ;;  %v1204_v61 = vld [vmem:[%s1547_s1 + $0x158] sm:$0xff]  }
   0xf   :  { %v1198_v56 = vld [vmem:[%s1547_s1 + $0x108] sm:$0xff]   ;;  %v1202_v60 = vld [vmem:[%s1547_s1 + $0x110] sm:$0xff]   ;;  %v1205_v63 = vld [vmem:[%s1547_s1 + $0x1d8] sm:$0xff]  }
  0x10   :  { %1029 = vmatpush3.bf16.msra.mxu0 %v1173_v14  ;;  %v209_v49 = vrot.slane %v181_v46, %v1398_v41  ;;  %638 = vmatprep.mubr.bf16.mxu0 %v202_v47  ;;  %v212_v52 = vcombine.high %v202_v47, %v202_v47  ;;  %v1199_v58 = vld [vmem:[%s1547_s1 + $0x188] sm:$0xff]   ;;  %v1203_v62 = vld [vmem:[%s1547_s1 + $0x190] sm:$0xff]   ;;  %v1206_v0 = vld [vmem:[%s1547_s1 + $0x118] sm:$0xff]  }
  0x11   :  { %1051 = vmatpush3.bf16.msra.mxu1 %v1174_v15  ;;  %1030 = vmatprep.subr.bf16.mxu0 %v1175_v16  ;;  %v1208_v1 = vld [vmem:[%s1547_s1 + $0x160] sm:$0xff]   ;;  %v1207_v2 = vld [vmem:[%s1547_s1 + $0x198] sm:$0xff]   ;;  %v1212_v5 = vld [vmem:[%s1547_s1 + $0x168] sm:$0xff]  }
  0x12   :  { %1052 = vmatprep.subr.bf16.mxu1 %v1176_v17  ;;  %v213_v55 = vcombine.high %v209_v49, %v209_v49  ;;  %678 = vmatprep.mubr.bf16.mxu1 %v212_v52  ;;  %v1209_v3 = vld [vmem:[%s1547_s1 + $0x1e0] sm:$0xff]   ;;  %v1213_v7 = vld [vmem:[%s1547_s1 + $0x1e8] sm:$0xff]   ;;  %v1216_v9 = vld [vmem:[%s1547_s1 + $0x170] sm:$0xff]  }
  0x13   :  { %v1210_v4 = vld [vmem:[%s1547_s1 + $0x120] sm:$0xff]   ;;  %v1214_v8 = vld [vmem:[%s1547_s1 + $0x128] sm:$0xff]  }
  0x14   :  { %1031 = vmatpush3.bf16.msra.mxu0 %v1177_v18  ;;  %v1211_v6 = vld [vmem:[%s1547_s1 + $0x1a0] sm:$0xff]  }
  0x15   :  { %1053 = vmatpush3.bf16.msra.mxu1 %v1178_v19  ;;  %1032 = vmatprep.subr.bf16.mxu0 %v1179_v20 }
  0x16   :  { %1054 = vmatprep.subr.bf16.mxu1 %v1180_v21 }
  0x18   :  { %1033 = vmatpush3.bf16.msra.mxu0 %v1181_v22 }
  0x19   :  { %1055 = vmatpush3.bf16.msra.mxu1 %v1182_v23  ;;  %1034 = vmatprep.subr.bf16.mxu0 %v1183_v24 }
  0x1a   :  { %1056 = vmatprep.subr.bf16.mxu1 %v1184_v25 }
  0x1c   :  { %1035 = vmatpush3.bf16.msra.mxu0 %v1185_v26 }
  0x1d   :  { %1057 = vmatpush3.bf16.msra.mxu1 %v1186_v27  ;;  %1036 = vmatprep.subr.bf16.mxu0 %v1187_v29 }
  0x1e   :  { %1058 = vmatprep.subr.bf16.mxu1 %v1188_v30 }
  0x20   :  { %1037 = vmatpush3.bf16.msra.mxu0 %v1189_v31 }
  0x21   :  { %1059 = vmatpush3.bf16.msra.mxu1 %v1190_v32  ;;  %1066 = vmatprep.subr.bf16.mxu0 %v1192_v35 }
  0x22   :  { %1088 = vmatprep.subr.bf16.mxu1 %v1193_v38 }
  0x23   :  { %639 = vmatmul.mubr.bf16.vlgmr.msra.gmra.mrb[0].mxu0 %v188_v45 }
  0x24   :  { %1067 = vmatpush3.bf16.msra.mxu0 %v1194_v48  ;;  %679 = vmatmul.mubr.bf16.vlgmr.msra.gmra.mrb[0].mxu1 %v210_v50 }
  0x25   :  { %1068 = vmatprep.subr.bf16.mxu0 %v1196_v51  ;;  %1089 = vmatpush3.bf16.msra.mxu1 %v1195_v53 }
  0x26   :  { %718 = vmatprep.mubr.bf16.mxu0 %v209_v49  ;;  %1090 = vmatprep.subr.bf16.mxu1 %v1197_v54 }
  0x27   :  { %758 = vmatprep.mubr.bf16.mxu1 %v213_v55 }
  0x28   :  { %1069 = vmatpush3.bf16.msra.mxu0 %v1198_v56 }
  0x29   :  { %1070 = vmatprep.subr.bf16.mxu0 %v1200_v57  ;;  %1091 = vmatpush3.bf16.msra.mxu1 %v1199_v58 }
  0x2a   :  { %1092 = vmatprep.subr.bf16.mxu1 %v1201_v59 }
  0x2c   :  { %1071 = vmatpush3.bf16.msra.mxu0 %v1202_v60 }
  0x2d   :  { %1072 = vmatprep.subr.bf16.mxu0 %v1204_v61  ;;  %1093 = vmatpush3.bf16.msra.mxu1 %v1203_v62 }
  0x2e   :  { %1094 = vmatprep.subr.bf16.mxu1 %v1205_v63 }
  0x30   :  { %1073 = vmatpush3.bf16.msra.mxu0 %v1206_v0 }
  0x31   :  { %1074 = vmatprep.subr.bf16.mxu0 %v1208_v1  ;;  %1095 = vmatpush3.bf16.msra.mxu1 %v1207_v2 }
  0x32   :  { %1096 = vmatprep.subr.bf16.mxu1 %v1209_v3 }
  0x34   :  { %1075 = vmatpush3.bf16.msra.mxu0 %v1210_v4 }
  0x35   :  { %1076 = vmatprep.subr.bf16.mxu0 %v1212_v5 }
  0x36   :  { %12 = vsyncpa [#allocation3], 0  ;;  %1097 = vmatpush3.bf16.msra.mxu1 %v1211_v6  ;;  %v1215_v10 = vld [vmem:[%s1547_s1 + $0x1a8] sm:$0xff]   ;;  %v1217_v11 = vld [vmem:[%s1547_s1 + $0x1f0] sm:$0xff]   ;;  %v195_v17 = vrot.slane %v1402_v43, %v1398_v41  ;;  %v1249_v23 = vmov 0.0|0.0   ;;  %vm1250_vm0 = vmmov 0  }
  0x37   :  { %1098 = vmatprep.subr.bf16.mxu1 %v1213_v7  ;;  %v1218_v12 = vld [vmem:[%s1547_s1 + $0x130] sm:$0xff]   ;;  %v1220_v13 = vld [vmem:[%s1547_s1 + $0x178] sm:$0xff]   ;;  %v767_v20 = vld [vmem:[%s1549_s3] sm:$0xff]  ;;  %v1251_v27 = vmov 0.0   ;;  %vm778_vm1 = vcmask 261120   ;;  %s1252_s8 = smov [#allocation2]  }
  0x38   :  { %1077 = vmatpush3.bf16.msra.mxu0 %v1214_v8  ;;  %v1219_v14 = vld [vmem:[%s1547_s1 + $0x1b0] sm:$0xff]   ;;  %v1221_v15 = vld [vmem:[%s1547_s1 + $0x1f8] sm:$0xff]   ;;  %v211_v19 = vcombine.high %v195_v17, %v195_v17  ;;  %v768_v21 = vld [vmem:[%s1549_s3 + $0x8] sm:$0xff]  ;;  %s945_s9 = sshll.u32 %s1252_s8, 4  ;;  %vm937_vm2 = vcmask 74752   ;;  %s946_s9 = int_to_ptr.vmem [resolvable:$true] %s945_s9 }
  0x39   :  { %1078 = vmatprep.subr.bf16.mxu0 %v1216_v9  ;;  %v1222_v16 = vld [vmem:[%s1547_s1 + $0x138] sm:$0xff]   ;;  %v1143_v22 = vpack.c.bf16 %v768_v21, %v767_v20  ;;  %v769_v24 = vld [vmem:[%s1549_s3 + $0x10] sm:$0xff]  ;;  %v853_v28 = vld [vmem:[%s1551_s5] sm:$0xff]  ;;  %p1229_p1 = scmp.lt.s32.totalorder %s946_s9, %s946_s9 }
  0x3a   :  { %1099 = vmatpush3.bf16.msra.mxu1 %v1215_v10  ;;  %v1223_v18 = vld [vmem:[%s1547_s1 + $0x1b8] sm:$0xff]   ;;  %v854_v29 = vld [vmem:[%s1551_s5 + $0x8] sm:$0xff]  ;;  %v953_v32 = vld [vmem:[%s1548_s2] ss:$0 sm:$0xff] }
  0x3b   :  { %1100 = vmatprep.subr.bf16.mxu1 %v1217_v11  ;;  %v770_v25 = vld [vmem:[%s1549_s3 + $0x18] sm:$0xff]  ;;  %v1149_v30 = vpack.c.bf16 %v854_v29, %v853_v28  ;;  %v855_v57 = vld [vmem:[%s1551_s5 + $0x10] sm:$0xff]  ;;  %v1018_v60 = vld [vmem:[%s1550_s4] ss:$0 sm:$0xff] }
  0x3c   :  { %1079 = vmatpush3.bf16.msra.mxu0 %v1218_v12  ;;  %v1146_v26 = vpack.c.bf16 %v770_v25, %v769_v24  ;;  %v856_v58 = vld [vmem:[%s1551_s5 + $0x18] sm:$0xff]  ;;  %v1020_v1 = vld [vmem:[%s1552_s6] ss:$0 sm:$0xff]  ;;  %s1224_s5 = scalar_lea.vmem %s946_s9, 32 }
  0x3d   :  { %1080 = vmatprep.subr.bf16.mxu0 %v1220_v13  ;;  %v1152_v59 = vpack.c.bf16 %v856_v58, %v855_v57  ;;  %p1225_p0 = scmp.ne.s32.totalorder %s946_s9, %s1224_s5  ;;  %p1230_p2 = scmp.lt.s32.totalorder %s1224_s5, %s1224_s5 }
  0x3e   :  { %1101 = vmatpush3.bf16.msra.mxu1 %v1219_v14 }
  0x3f   :  { %1102 = vmatprep.subr.bf16.mxu1 %v1221_v15  ;;  %p1231_p3 = por %p1230_p2, %p1229_p1 }
  0x40   :  { %1081 = vmatpush3.bf16.msra.mxu0 %v1222_v16 }
  0x41   :  { %1142 = vmatprep.subr.bf16.mxu0 %v1249_v23  ;;  %p1232_p4 = pnand %p1231_p3, %p1225_p0 }
  0x42   :  { %1103 = vmatpush3.bf16.msra.mxu1 %v1223_v18 }
  0x43   :  { %719 = vmatmul.mubr.bf16.vlgmr.msra.gmra.mrb[4].mxu0 %v195_v17  ;;  %1148 = vmatprep.subr.bf16.mxu1 %v1249_v23 }
  0x44   :  { %1144 = vmatpush3.bf16.msra.mxu0 %v1143_v22  ;;  %1128 = vmatprep.mubr.msk.f32.mxu0 %vm1250_vm0, %v1251_v27 }
  0x45   :  { %759 = vmatmul.mubr.bf16.vlgmr.msra.gmra.mrb[4].mxu1 %v211_v19  ;;  %1145 = vmatprep.subr.bf16.mxu0 %v1249_v23 }
  0x46   :  { %1139 = vmatprep.mubr.msk.f32.mxu1 %vm1250_vm0, %v1251_v27  ;;  %1150 = vmatpush3.bf16.msra.mxu1 %v1149_v30 }
  0x47   :  { %1151 = vmatprep.subr.bf16.mxu1 %v1249_v23 }
  0x48   :  { %1147 = vmatpush3.bf16.msra.mxu0 %v1146_v26 }
  0x4a   :  { %1153 = vmatpush3.bf16.msra.mxu1 %v1152_v59 }
  0xf6   :  { %v1038_v31 = vpop.f32.mrb[0].mxu0 }
  0xf7   :  { %v1039_v33 = vpop.f32.mrb[1].mxu0  ;;  %v1060_v34 = vpop.f32.mrb[0].mxu1 }
  0xf8   :  { %v1040_v35 = vadd.f32 %v1039_v33, %v1038_v31  ;;  %v1041_v36 = vpop.f32.mrb[2].mxu0  ;;  %v1061_v37 = vpop.f32.mrb[1].mxu1 }
  0xf9   :  { %v1042_v38 = vpop.f32.mrb[3].mxu0  ;;  %v1062_v40 = vadd.f32 %v1061_v37, %v1060_v34  ;;  %v1063_v41 = vpop.f32.mrb[2].mxu1 }
  0xfa   :  { %v641_v39 = vadd.f32 %v1040_v35, %v953_v32  ;;  %v1064_v42 = vpop.f32.mrb[3].mxu1 }
  0xfc   :  { %v681_v43 = vadd.f32 %v1062_v40, %v641_v39 }
 0x116   :  { %v1082_v44 = vpop.f32.mrb[4].mxu0 }
 0x117   :  { %v1083_v45 = vpop.f32.mrb[5].mxu0 }
 0x118   :  { %v1104_v46 = vpop.f32.mrb[4].mxu1  ;;  %v1084_v47 = vadd.f32 %v1083_v45, %v1082_v44  ;;  %v1085_v48 = vpop.f32.mrb[6].mxu0 }
 0x119   :  { %v1105_v49 = vpop.f32.mrb[5].mxu1  ;;  %v1086_v50 = vpop.f32.mrb[7].mxu0 }
 0x11a   :  { %v721_v51 = vadd.f32 %v1084_v47, %v681_v43  ;;  %v1106_v52 = vadd.f32 %v1105_v49, %v1104_v46  ;;  %v1107_v53 = vpop.f32.mrb[6].mxu1 }
 0x11b   :  { %v1108_v54 = vpop.f32.mrb[7].mxu1 }
 0x11c   :  { %v761_v55 = vadd.f32 %v1106_v52, %v721_v51 }
 0x11e   :  { %v766_v56 = vmax.f32 %v761_v55, 0.0 }
 0x120   :  { %1129 = vmatmul.mubr.msk.f32.vlgmr.msra.gmra.mrb[8].mxu0 %vm778_vm1, %v766_v56 }
 0x1f3   :  { %v848_v61 = vpop.f32.mrb[8].mxu0 }
 0x1f4   :  { %v849_v62 = vadd.f32 %v1018_v60, %v848_v61  ;;  %v1130_v63 = vpop.f32.mrb[9].mxu0 }
 0x1f6   :  { %v852_v0 = vmax.f32 %v849_v62, 0.0 }
 0x1f8   :  { %1140 = vmatmul.mubr.msk.f32.vlgmr.msra.gmra.mrb[8].mxu1 %vm778_vm1, %v852_v0 }
 0x2cb   :  { %v933_v2 = vpop.f32.mrb[8].mxu1 }
 0x2cc   :  { %v934_v3 = vadd.f32 %v1020_v1, %v933_v2  ;;  %v1141_v4 = vpop.f32.mrb[9].mxu1 }
 0x2ce   :  { %938 = vst.msk [vmem:[#allocation2] sm:$0x3] %vm937_vm2, %v934_v3 }
 0x2cf   :  { %1235 = shalt.err (!%p1232_p4)
}
 0x2d0   :  { %s1236_s11 = scalar_lea.hbm %s1553_s7, 32 }
 0x2d1   :  { %p1237_p5 = scmp.ne.s32.totalorder %s1553_s7, %s1236_s11  ;;  %p1240_p6 = scmp.lt.u32.totalorder %s1236_s11, %s1553_s7 }
 0x2d3   :  { %p1242_p7 = pnand %p1240_p6, %p1237_p5 }
 0x2d5   :  { %1245 = shalt.err (!%p1242_p7)
}
 0x2d6   :  { %948 = dma.vmem_to_hbm [thread:$0]  %s946_s9, 32, %s1553_s7, [#allocation3]  }
 0x2d7   :  { %1246 = dma.done.wait [#allocation3], 32  }
 0x2d8   :  { %1247 = vsyncadd [#allocation3], 4294967264 }
 0x2d9   :  { %952 = vsyncpa [#allocation3], 1 }

</bundles_post_ra>
